<compile_context>
chip_gen: v6e
topology: v6e:2x2x1
jax: 0.10.0
libtpu: 0.0.40
codegen_flags: <defaults>
</compile_context>

<pallas_src>
import math

import jax
import jax.numpy as jnp
from jax.experimental import pallas as pl
from jax.experimental.pallas import tpu as pltpu


# ----------------------------------------------------------------------------
# Kernels
# ----------------------------------------------------------------------------

def ffn_kernel_resident(x_ref, w1_ref, b1_ref, w2_ref, b2_ref, o_ref):
    """Single-step: W1/W2/b1/b2 fully VMEM-resident (fetched once)."""
    x = x_ref[...].astype(w1_ref.dtype)          # cast at the dot (not in wrapper)
    h = jnp.dot(x, w1_ref[...], preferred_element_type=jnp.float32)
    h = jnp.maximum(h + b1_ref[...], 0.0)        # bias + ReLU in f32
    y = jnp.dot(h.astype(w2_ref.dtype), w2_ref[...],
                preferred_element_type=jnp.float32)
    o_ref[...] = (y + b2_ref[...]).astype(o_ref.dtype)


def ffn_kernel_stream(x_ref, w1_ref, b1_ref, w2_ref, b2_ref, o_ref, acc_ref):
    """Multi-step d_ff reduction with an f32 VMEM accumulator."""
    k = pl.program_id(1)

    @pl.when(k == 0)
    def _init():
        acc_ref[...] = jnp.zeros_like(acc_ref)

    x = x_ref[...].astype(w1_ref.dtype)
    h = jnp.dot(x, w1_ref[...], preferred_element_type=jnp.float32)
    h = jnp.maximum(h + b1_ref[...], 0.0)
    acc_ref[...] += jnp.dot(h.astype(w2_ref.dtype), w2_ref[...],
                            preferred_element_type=jnp.float32)

    @pl.when(k == pl.num_programs(1) - 1)
    def _finalize():
        o_ref[...] = (acc_ref[...] + b2_ref[...]).astype(o_ref.dtype)


# ----------------------------------------------------------------------------
# Helpers
# ----------------------------------------------------------------------------

def _round_up(a, b):
    return -(-a // b) * b


def _tile_bytes(rows, cols, itemsize):
    # (8, 128) layout padding in VMEM.
    return _round_up(max(rows, 1), 8) * _round_up(max(cols, 1), 128) * itemsize


def _device_vmem_capacity():
    try:
        cap = getattr(pltpu.get_tpu_info(), "vmem_capacity_bytes", None)
        if cap:
            return int(cap)
    except Exception:
        pass
    return 64 << 20  # conservative: v7x per-TensorCore VMEM


def _vmem_needed(tm, tff, d_pad, in_isz, w_isz, out_isz, multi_step):
    need = (2 * _tile_bytes(tm, d_pad, in_isz)       # x tile (double buffered)
            + 2 * _tile_bytes(tm, d_pad, out_isz)    # out tile
            + 2 * _tile_bytes(d_pad, tff, w_isz)     # W1 slab
            + 2 * _tile_bytes(tff, d_pad, w_isz)     # W2 slab
            + 2 * _tile_bytes(1, tff, 4)             # b1 slab
            + 2 * _tile_bytes(1, d_pad, 4)           # b2
            + _tile_bytes(tm, d_pad, w_isz)          # x cast copy
            + _tile_bytes(tm, tff, 4)                # h (f32 intermediate)
            + _tile_bytes(tm, tff, w_isz))           # h cast copy
    if multi_step:
        need += _tile_bytes(tm, d_pad, 4)            # f32 accumulator
    return need


# ----------------------------------------------------------------------------
# Wrapper
# ----------------------------------------------------------------------------

def position_wise_feed_forward(x, w1, b1, w2, b2, *, tm=256, tff=None,
                               compute_dtype=jnp.bfloat16):
    """y = relu(x @ W1 + b1) @ W2 + b2 for x: [..., d_model].

    W1: (d_model, d_ff), W2: (d_ff, d_model)  (transposed nn.Linear layout).
    Both MXU matmuls run in `compute_dtype` (bf16 default) with f32
    accumulation; bias + ReLU are applied in f32.
    """
    d_model = x.shape[-1]
    d_ff = w1.shape[-1]
    assert w1.shape == (d_model, d_ff) and w2.shape == (d_ff, d_model)
    assert b1.shape[-1] == d_ff and b2.shape[-1] == d_model
    lead_shape = x.shape[:-1]
    m = int(math.prod(lead_shape)) if lead_shape else 1
    out_dtype = x.dtype

    x2d = x.reshape(m, d_model)

    # Lane-dense feature axis: pad d_model to a multiple of 128 once.
    d_pad = max(_round_up(d_model, 128), 128)
    if d_pad != d_model:
        pad_f = d_pad - d_model
        x2d = jnp.pad(x2d, ((0, 0), (0, pad_f)))
        w1 = jnp.pad(w1, ((0, pad_f), (0, 0)))
        w2 = jnp.pad(w2, ((0, 0), (0, pad_f)))
        b2 = jnp.pad(b2.reshape(-1), (0, pad_f))

    w1 = w1.astype(compute_dtype)
    w2 = w2.astype(compute_dtype)
    b1_2d = b1.reshape(1, d_ff).astype(jnp.float32)
    b2_2d = b2.reshape(1, d_pad).astype(jnp.float32)

    in_isz = jnp.dtype(x2d.dtype).itemsize
    w_isz = jnp.dtype(compute_dtype).itemsize
    out_isz = jnp.dtype(out_dtype).itemsize

    # Row tile: never larger than m; guarantee >= 2 row tiles when m > 8 so
    # the "parallel" row axis can shard across both v7x TensorCores.
    tm = min(tm, m)
    if pl.cdiv(m, tm) == 1 and m > 8:
        tm = _round_up(-(-m // 2), 8)

    vmem_cap = _device_vmem_capacity()
    budget = max(vmem_cap - (8 << 20), 16 << 20)

    # Reduction tile: prefer fully resident weights (tff == d_ff: single grid
    # step, weights fetched once); otherwise stream 256-multiple slabs.
    if tff is None:
        candidates = [d_ff] + [c for c in (512, 256, 128)
                               if c < d_ff and d_ff % c == 0]
        tff = candidates[-1]
        for cand in candidates:
            if _vmem_needed(tm, cand, d_pad, in_isz, w_isz, out_isz,
                            cand < d_ff) <= budget:
                tff = cand
                break
    assert d_ff % tff == 0, (d_ff, tff)

    # Short-reduction collapse: <=2 k-steps can't hide weight DMA anyway and
    # pay accumulator RMW + per-step overhead for nothing.
    if tff < d_ff and d_ff // tff <= 2 and \
            _vmem_needed(tm, d_ff, d_pad, in_isz, w_isz, out_isz, False) <= budget:
        tff = d_ff

    single_step = (tff == d_ff)
    k_steps = d_ff // tff
    num_row_tiles = pl.cdiv(m, tm)

    vmem_needed = _vmem_needed(tm, tff, d_pad, in_isz, w_isz, out_isz,
                               not single_step)
    vmem_limit = int(min(max(vmem_needed + (4 << 20), 32 << 20), vmem_cap))

    weight_bytes = (w1.size + w2.size) * w_isz
    weight_passes = 1 if single_step else num_row_tiles
    cost = pl.CostEstimate(
        flops=4 * m * d_pad * d_ff,
        transcendentals=0,
        bytes_accessed=(x2d.size * in_isz
                        + weight_passes * weight_bytes
                        + b1_2d.size * 4 + b2_2d.size * 4
                        + m * d_pad * out_isz),
    )

    if single_step:
        grid_spec = pltpu.PrefetchScalarGridSpec(
            num_scalar_prefetch=0,
            grid=(num_row_tiles,),
            in_specs=[
                pl.BlockSpec((tm, d_pad), lambda i: (i, 0)),     # x rows
                pl.BlockSpec((d_pad, d_ff), lambda i: (0, 0)),   # W1 (resident)
                pl.BlockSpec((1, d_ff), lambda i: (0, 0)),       # b1 (resident)
                pl.BlockSpec((d_ff, d_pad), lambda i: (0, 0)),   # W2 (resident)
                pl.BlockSpec((1, d_pad), lambda i: (0, 0)),      # b2 (resident)
            ],
            out_specs=pl.BlockSpec((tm, d_pad), lambda i: (i, 0)),
        )
        kernel = ffn_kernel_resident
        dim_sem = ("parallel",)
    else:
        grid_spec = pltpu.PrefetchScalarGridSpec(
            num_scalar_prefetch=0,
            grid=(num_row_tiles, k_steps),
            in_specs=[
                pl.BlockSpec((tm, d_pad), lambda i, k: (i, 0)),   # x rows
                pl.BlockSpec((d_pad, tff), lambda i, k: (0, k)),  # W1 slab
                pl.BlockSpec((1, tff), lambda i, k: (0, k)),      # b1 slab
                pl.BlockSpec((tff, d_pad), lambda i, k: (k, 0)),  # W2 slab
                pl.BlockSpec((1, d_pad), lambda i, k: (0, 0)),    # b2
            ],
            out_specs=pl.BlockSpec((tm, d_pad), lambda i, k: (i, 0)),
            scratch_shapes=[pltpu.VMEM((tm, d_pad), jnp.float32)],
        )
        kernel = ffn_kernel_stream
        dim_sem = ("parallel", "arbitrary")

    out2d = pl.pallas_call(
        kernel,
        out_shape=jax.ShapeDtypeStruct((m, d_pad), out_dtype),
        grid_spec=grid_spec,
        compiler_params=pltpu.CompilerParams(
            dimension_semantics=dim_sem,
            vmem_limit_bytes=vmem_limit),
        cost_estimate=cost,
    )(x2d, w1, b1_2d, w2, b2_2d)

    if d_pad != d_model:
        out2d = out2d[:, :d_model]
    return out2d.reshape(*lead_shape, d_model)


def init_params(key, d_model, d_ff, dtype=jnp.float32):
    """Deterministic init mimicking nn.Linear: U(-1/sqrt(fan_in), ...)."""
    k1, k2, k3, k4 = jax.random.split(key, 4)
    bound1 = 1.0 / math.sqrt(d_model)
    bound2 = 1.0 / math.sqrt(d_ff)
    w1 = jax.random.uniform(k1, (d_model, d_ff), dtype, -bound1, bound1)
    b1 = jax.random.uniform(k2, (d_ff,), dtype, -bound1, bound1)
    w2 = jax.random.uniform(k3, (d_ff, d_model), dtype, -bound2, bound2)
    b2 = jax.random.uniform(k4, (d_model,), dtype, -bound2, bound2)
    return w1, b1, w2, b2


if __name__ == "__main__":
    # Shapes from the module spec (d_model = 1, d_ff = 1024); small batch/seq.
    batch, seq, d_model, d_ff = 2, 8, 1, 1024

    key = jax.random.PRNGKey(0)
    kx, kx2, kp = jax.random.split(key, 3)
    x = jax.random.normal(kx, (batch, seq, d_model), jnp.float32)
    w1, b1, w2, b2 = init_params(kp, d_model, d_ff)

    prec = jax.lax.Precision.HIGHEST

    def ref_ffn(xx):
        h = jnp.maximum(jnp.matmul(xx, w1, precision=prec) + b1, 0.0)
        return jnp.matmul(h, w2, precision=prec) + b2

    ref = ref_ffn(x)

    # Default path: bf16 MXU matmuls, f32 accumulation, resident weights.
    out = jax.block_until_ready(position_wise_feed_forward(x, w1, b1, w2, b2))
    assert out.shape == x.shape, (out.shape, x.shape)
    assert jnp.allclose(out, ref, atol=2e-1, rtol=2e-1), \
        float(jnp.max(jnp.abs(out - ref)))

    # f32 compute path (module is f64; no f64 MXU -> f32-level tolerance).
    out_f32 = jax.block_until_ready(
        position_wise_feed_forward(x, w1, b1, w2, b2,
                                   compute_dtype=jnp.float32))
    assert jnp.allclose(out_f32, ref, atol=1e-3, rtol=1e-3), \
        float(jnp.max(jnp.abs(out_f32 - ref)))

    # Ragged row count + small row tile: partial-last-row-block masking.
    x_odd = jax.random.normal(kx2, (3, 5, d_model), jnp.float32)
    ref_odd = ref_ffn(x_odd)
    out_odd = jax.block_until_ready(
        position_wise_feed_forward(x_odd, w1, b1, w2, b2, tm=8,
                                   compute_dtype=jnp.float32))
    assert out_odd.shape == x_odd.shape
    assert jnp.allclose(out_odd, ref_odd, atol=1e-3, rtol=1e-3), \
        float(jnp.max(jnp.abs(out_odd - ref_odd)))

    # Streamed-weight fallback (explicit tff < d_ff): exercises the
    # accumulator kernel over the d_ff reduction axis.
    out_stream = jax.block_until_ready(
        position_wise_feed_forward(x, w1, b1, w2, b2, tff=256,
                                   compute_dtype=jnp.float32))
    assert jnp.allclose(out_stream, ref, atol=1e-3, rtol=1e-3), \
        float(jnp.max(jnp.abs(out_stream - ref)))

    print("KERNEL_OK")
</pallas_src>

<mosaic_0001>
module attributes {stable_mosaic.version = 11 : i64} {
  func.func @ffn_kernel_resident(%arg0: i32, %arg1: memref<8x128xf32, #tpu.memory_space<vmem>>, %arg2: memref<128x1024xbf16, #tpu.memory_space<vmem>>, %arg3: memref<1x1024xf32, #tpu.memory_space<vmem>>, %arg4: memref<1024x128xbf16, #tpu.memory_space<vmem>>, %arg5: memref<1x128xf32, #tpu.memory_space<vmem>>, %arg6: memref<8x128xf32, #tpu.memory_space<vmem>>) attributes {dimension_semantics = [#tpu.dimension_semantics<parallel>], iteration_bounds = array<i64: 2>, scalar_prefetch = 0 : i64, scratch_operands = 0 : i64, tpu.core_type = #tpu.core_type<tc>, window_params = [{transform_indices = @transform_0, window_bounds = array<i64: 8, 128>}, {pipeline_mode = #tpu.pipeline_mode<synchronous>, transform_indices = @transform_1, window_bounds = array<i64: 128, 1024>}, {pipeline_mode = #tpu.pipeline_mode<synchronous>, transform_indices = @transform_2, window_bounds = array<i64: 1, 1024>}, {pipeline_mode = #tpu.pipeline_mode<synchronous>, transform_indices = @transform_3, window_bounds = array<i64: 1024, 128>}, {pipeline_mode = #tpu.pipeline_mode<synchronous>, transform_indices = @transform_4, window_bounds = array<i64: 1, 128>}, {transform_indices = @transform_5, window_bounds = array<i64: 8, 128>}]} {
    %c0 = arith.constant 0 : index
    %c0_0 = arith.constant 0 : index
    %0 = vector.load %arg1[%c0, %c0_0] : memref<8x128xf32, #tpu.memory_space<vmem>>, vector<8x128xf32>
    %1 = arith.truncf %0 : vector<8x128xf32> to vector<8x128xbf16>
    %c0_1 = arith.constant 0 : index
    %c0_2 = arith.constant 0 : index
    %2 = vector.load %arg2[%c0_1, %c0_2] : memref<128x1024xbf16, #tpu.memory_space<vmem>>, vector<128x1024xbf16>
    %cst = arith.constant dense<0.000000e+00> : vector<8x1024xf32>
    %3 = tpu.matmul %1, %2, %cst {dimension_numbers = #tpu.dot_dimension_numbers<[1], [0], [0], [1], [0, 0, 1, 1], [], []>} : vector<8x128xbf16>, vector<128x1024xbf16>, vector<8x1024xf32> -> vector<8x1024xf32>
    %c0_3 = arith.constant 0 : index
    %c0_4 = arith.constant 0 : index
    %4 = vector.load %arg3[%c0_3, %c0_4] : memref<1x1024xf32, #tpu.memory_space<vmem>>, vector<1x1024xf32>
    %5 = vector.broadcast %4 : vector<1x1024xf32> to vector<8x1024xf32>
    %6 = arith.addf %3, %5 : vector<8x1024xf32>
    %cst_5 = arith.constant 0.000000e+00 : f32
    %7 = vector.broadcast %cst_5 : f32 to vector<8x1024xf32>
    %8 = arith.maximumf %6, %7 : vector<8x1024xf32>
    %9 = arith.truncf %8 : vector<8x1024xf32> to vector<8x1024xbf16>
    %c0_6 = arith.constant 0 : index
    %c0_7 = arith.constant 0 : index
    %10 = vector.load %arg4[%c0_6, %c0_7] : memref<1024x128xbf16, #tpu.memory_space<vmem>>, vector<1024x128xbf16>
    %cst_8 = arith.constant dense<0.000000e+00> : vector<8x128xf32>
    %11 = tpu.matmul %9, %10, %cst_8 {dimension_numbers = #tpu.dot_dimension_numbers<[1], [0], [0], [1], [0, 0, 1, 1], [], []>} : vector<8x1024xbf16>, vector<1024x128xbf16>, vector<8x128xf32> -> vector<8x128xf32>
    %c0_9 = arith.constant 0 : index
    %c0_10 = arith.constant 0 : index
    %12 = vector.load %arg5[%c0_9, %c0_10] : memref<1x128xf32, #tpu.memory_space<vmem>>, vector<1x128xf32>
    %13 = vector.broadcast %12 : vector<1x128xf32> to vector<8x128xf32>
    %14 = arith.addf %11, %13 : vector<8x128xf32>
    %c0_11 = arith.constant 0 : index
    %c0_12 = arith.constant 0 : index
    %15 = vector.load %arg6[%c0_11, %c0_12] : memref<8x128xf32, #tpu.memory_space<vmem>>, vector<8x128xf32>
    tpu.vector_store %arg6[%c0_11, %c0_12], %14 {strides = array<i32>} : memref<8x128xf32, #tpu.memory_space<vmem>>, vector<8x128xf32>,
    return
  }
  func.func @transform_0(%arg0: i32) -> (i32, i32) {
    %c0_i32 = arith.constant 0 : i32
    %c0_i32_0 = arith.constant 0 : i32
    return %arg0, %c0_i32 : i32, i32
  }
  func.func @transform_1(%arg0: i32) -> (i32, i32) {
    %c0_i32 = arith.constant 0 : i32
    %c0_i32_0 = arith.constant 0 : i32
    %c0_i32_1 = arith.constant 0 : i32
    return %c0_i32, %c0_i32_0 : i32, i32
  }
  func.func @transform_2(%arg0: i32) -> (i32, i32) {
    %c0_i32 = arith.constant 0 : i32
    %c0_i32_0 = arith.constant 0 : i32
    %c0_i32_1 = arith.constant 0 : i32
    return %c0_i32, %c0_i32_0 : i32, i32
  }
  func.func @transform_3(%arg0: i32) -> (i32, i32) {
    %c0_i32 = arith.constant 0 : i32
    %c0_i32_0 = arith.constant 0 : i32
    %c0_i32_1 = arith.constant 0 : i32
    return %c0_i32, %c0_i32_0 : i32, i32
  }
  func.func @transform_4(%arg0: i32) -> (i32, i32) {
    %c0_i32 = arith.constant 0 : i32
    %c0_i32_0 = arith.constant 0 : i32
    %c0_i32_1 = arith.constant 0 : i32
    return %c0_i32, %c0_i32_0 : i32, i32
  }
  func.func @transform_5(%arg0: i32) -> (i32, i32) {
    %c0_i32 = arith.constant 0 : i32
    %c0_i32_0 = arith.constant 0 : i32
    return %arg0, %c0_i32 : i32, i32
  }
}

</mosaic_0001>

<bundles_post_ra>
// kernel: tpu_custom_call.1
= control target key start
LH: loop header
LB: loop body
LE: loop exit
PB: predicated region body
PF: predicated region fallthrough
CT: control target
= control target key end

     0   :  { %10 = vsyncpa [#allocation3], 0  ;;  %s2502_s0 = inlined_call_operand.hbm [shape: f32[16,128], index: 0, kind: input, shape index: {}]   ;;  %s2503_s1 = inlined_call_operand.hbm [shape: bf16[128,1024], index: 1, kind: input, shape index: {}]   ;;  %s2504_s2 = inlined_call_operand.hbm [shape: f32[1,1024], index: 2, kind: input, shape index: {}]   ;;  %s2505_s3 = inlined_call_operand.hbm [shape: bf16[1024,128], index: 3, kind: input, shape index: {}]   ;;  %s2506_s4 = inlined_call_operand.vmem [shape: f32[1,128], index: 4, kind: input, shape index: {}]   ;;  %s2507_s5 = inlined_call_operand.hbm [shape: f32[16,128], index: 5, kind: output, shape index: {}]  }
   0x1   :  { %12 = vsyncpa [#allocation3 + $0x1], 0 }
   0x2   :  { %13 = vsyncpa [#allocation6], 0 }
   0x3   :  { %14 = vsyncpa [#allocation9], 0 }
   0x4   :  { %15 = vsyncpa [#allocation4], 0 }
   0x5   :  { %17 = vsyncpa [#allocation4 + $0x1], 0  ;;  %s2285_s18 = smov 0   ;;  %s2287_s19 = smov 0  }
   0x6   :  { %s2289_s20 = smov 0   ;;  %s2291_s21 = smov 0  }
   0x7 LB: > { %s2306_s22 = sadd.s32 4294967295, %s2243_s21   ;;  %s1684_s23 = sadd.s32 4294967294, %s2243_s21   ;;  %s2243_s21 = sphi %s2291_s21, %s2531_s21   ;;  %s2239_s20 = sphi %s2289_s20, %s2530_s20   ;;  %s2235_s19 = sphi %s2287_s19, %s2529_s19   ;;  %s2231_s18 = sphi %s2285_s18, %s2528_s18  }
   0x8   : > { %p43_p0 = scmp.ne.s32.totalorder %s2235_s19, %s2231_s18  ;;  %p2508_p1 = scmp.eq.s32.totalorder %s2306_s22, 0 }
   0x9   : > { %p157_p3 = scmp.eq.s32.totalorder %s1684_s23, 1  ;;  %p1685_p5 = scmp.ge.s32.totalorder %s2243_s21, 1 }
   0xa   : > { %p2315_p4 = por %p2508_p1, %p43_p0  ;;  %p164_p7 = scmp.lt.s32.totalorder %s2243_s21, 3 }
   0xb   : > { %p2320_p6 = por %p157_p3, %p43_p0  ;;  %s2245_s27 = smov [#allocation5]  }
   0xc   : > { %s2512_s24 = scalar_select %p2315_p4, 1, 0 }
   0xd   : > { %s2513_s25 = scalar_select %p2320_p6, 1, 0 }
   0xe   : > { %p2325_p8 = pnand %p1685_p5, %p164_p7  ;;  %s176_s28 = sshll.u32 %s2245_s27, 4  ;;  %s177_s28 = int_to_ptr.vmem [resolvable:$true] %s176_s28 }
   0xf   : > { %s2246_s30 = smov [#allocation7]   ;;  %s2247_s7 = smov [#allocation8]  }
  0x10   : > { %s2514_s26 = scalar_select %p2325_p8, 1, 0 }
  0x11   : > { %p1935_p9 = pneg %p2325_p8  ;;  %s190_s6 = sshll.u32 %s2246_s30, 4  ;;  %s191_s6 = int_to_ptr.vmem [resolvable:$true] %s190_s6 }
  0x12   : > { %s200_s8 = sshll.u32 %s2247_s7, 4  ;;  %s2076_s9 = scalar_lea.vmem %s177_s28, 8192  ;;  %s201_s8 = int_to_ptr.vmem [resolvable:$true] %s200_s8 }
  0x13   : > { %p2334_p11 = pnand %p1935_p9, %p2508_p1  ;;  %p2077_p13 = scmp.ne.s32.totalorder %s177_s28, %s2076_s9 }
  0x14   : > { %p2084_p5 = scmp.lt.s32.totalorder %s177_s28, %s177_s28  ;;  %p2085_p7 = scmp.lt.s32.totalorder %s2076_s9, %s2076_s9 }
  0x15   : > { %p2067_p12 = pneg %p2334_p11 }
  0x16   : > { %p2086_p9 = por %p2085_p7, %p2084_p5 }
  0x17   : > { %p2079_p0 = pnand %p2077_p13, %p2067_p12 }
  0x19   : > { %p2080_p3 = pneg %p2079_p0 }
  0x1b   : > { %p2087_p10 = pnand %p2086_p9, %p2080_p3 }
  0x1d   : > { %2090 = shalt.err (!%p2087_p10)
}
  0x1e   : > { %s2248_s10 = smov 512   ;;  %s2249_s11 = smov 32  }
  0x1f   : > { %1938 = dma.hbm_to_vmem [thread:$0]  (!%p2334_p11), %s2503_s1, 8192, %s177_s28, [#allocation6], %s2248_s10, %s2248_s10, %s2249_s11  }
  0x20   : > { %s2102_s14 = scalar_lea.vmem %s191_s6, 128  ;;  %p2110_p2 = scmp.lt.s32.totalorder %s191_s6, %s191_s6 }
  0x21   : > { %p2103_p1 = scmp.ne.s32.totalorder %s191_s6, %s2102_s14  ;;  %p2111_p6 = scmp.lt.s32.totalorder %s2102_s14, %s2102_s14 }
  0x23   : > { %p2105_p13 = pnand %p2103_p1, %p2067_p12  ;;  %p2112_p5 = por %p2111_p6, %p2110_p2 }
  0x25   : > { %p2106_p0 = pneg %p2105_p13 }
  0x27   : > { %p2113_p3 = pnand %p2112_p5, %p2106_p0 }
  0x29   : > { %2116 = shalt.err (!%p2113_p3)
}
  0x2a   : > { %1941 = dma.hbm_to_vmem [thread:$0]  (!%p2334_p11), %s2504_s2, 128, %s191_s6, [#allocation6]  }
  0x2b   : > { %s2128_s17 = scalar_lea.vmem %s201_s8, 8192  ;;  %p2136_p9 = scmp.lt.s32.totalorder %s201_s8, %s201_s8 }
  0x2c   : > { %p2129_p10 = scmp.ne.s32.totalorder %s201_s8, %s2128_s17  ;;  %p2137_p13 = scmp.lt.s32.totalorder %s2128_s17, %s2128_s17 }
  0x2e   : > { %p2131_p7 = pnand %p2129_p10, %p2067_p12  ;;  %p2138_p4 = por %p2137_p13, %p2136_p9 }
  0x30   : > { %p2132_p1 = pneg %p2131_p7 }
  0x32   : > { %p2139_p2 = pnand %p2138_p4, %p2132_p1 }
  0x34   : > { %2142 = shalt.err (!%p2139_p2)
}
  0x35   : > { %s2250_s23 = smov 64   ;;  %s2251_s27 = smov 4  }
  0x36   : > { %1944 = dma.hbm_to_vmem [thread:$0]  (!%p2334_p11), %s2505_s3, 8192, %s201_s8, [#allocation9], %s2250_s23, %s2250_s23, %s2251_s27  }
  0x37   : > { %s2365_s6 = sadd.s32 1, %s2243_s21   ;;  %s30_s9 = sadd.s32 1, %s2239_s20 }
  0x38   : > { %s27_s7 = ssub.s32 %s2243_s21, %s2365_s6  ;;  %p37_p6 = scmp.ne.s32.totalorder %s2239_s20, %s2235_s19 }
  0x39   : > { %p28_p4 = scmp.eq.s32.totalorder %s27_s7, 0  ;;  %p38_p12 = scmp.eq.s32.totalorder %s2243_s21, 0 }
  0x3a   : > { %p1956_p0 = scmp.lt.s32.totalorder %s2243_s21, 2  ;;  %p2516_p3 = scmp.eq.s32.totalorder %s2306_s22, 1 }
  0x3b   : > { %s2375_s10 = scalar_select %p28_p4, %s2239_s20, %s30_s9  }
  0x3c   : > { %p39_p5 = por %p38_p12, %p37_p6  ;;  %p2379_p10 = por %p2516_p3, %p37_p6 }
  0x3d   : > { %s217_s29 = sand.u32 1, %s2239_s20   ;;  %s1691_s12 = sshll.u32 %s2243_s21, 7 }
  0x3e   : > { %s2517_s11 = scalar_select %p2379_p10, 1, 0 }
  0x3f   : > { %s1690_s8 = sshll.u32 %s217_s29, 3  ;;  %s2388_s15 = scalar_lea.hbm %s2502_s0, %s1691_s12 }
  0x40   : > { %s221_s16 = scalar_lea.vmem [#allocation2], %s1690_s8  ;;  %p2390_p11 = pnand %p1956_p0, %p39_p5 }
  0x41   : > { %s228_s17 = sshll.u32 %s221_s16, 4  ;;  %s218_s27 = scalar_lea.sflag [#allocation3], %s217_s29  ;;  %s229_s17 = int_to_ptr.vmem [resolvable:$true] %s228_s17 }
  0x42   : > { %s2143_s28 = scalar_lea.hbm %s2388_s15, 128  ;;  %p2145_p1 = pneg %p2390_p11 }
  0x43   : > { %p2144_p7 = scmp.ne.s32.totalorder %s2388_s15, %s2143_s28  ;;  %s2148_s9 = scalar_lea.hbm %s2502_s0, 256 }
  0x44   : > { %p2149_p2 = scmp.lt.s32.totalorder %s2388_s15, %s2502_s0  ;;  %p2150_p4 = scmp.lt.s32.totalorder %s2148_s9, %s2143_s28 }
  0x45   : > { %p2146_p9 = pnand %p2145_p1, %p2144_p7 }
  0x46   : > { %p2151_p6 = por %p2150_p4, %p2149_p2 }
  0x47   : > { %p2147_p13 = pneg %p2146_p9 }
  0x49   : > { %p2152_p12 = pnand %p2151_p6, %p2147_p13 }
  0x4b   : > { %2155 = shalt.err (!%p2152_p12)
}
  0x4c   : > { %s2156_s13 = scalar_lea.vmem %s229_s17, 128  ;;  %s2252_s29 = smov [#allocation2]  }
  0x4d   : > { %p2157_p0 = scmp.ne.s32.totalorder %s229_s17, %s2156_s13  ;;  %s2161_s14 = sshll.u32 %s2252_s29, 4  ;;  %s2162_s14 = int_to_ptr.vmem [resolvable:$false] %s2161_s14 }
  0x4e   : > { %s2163_s16 = scalar_lea.vmem %s2162_s14, 256  ;;  %p2164_p7 = scmp.lt.s32.totalorder %s229_s17, %s2162_s14 }
  0x4f   : > { %p2159_p5 = pnand %p2157_p0, %p2145_p1  ;;  %p2165_p9 = scmp.lt.s32.totalorder %s2163_s16, %s2156_s13 }
  0x51   : > { %p2160_p3 = pneg %p2159_p5  ;;  %p2166_p10 = por %p2165_p9, %p2164_p7 }
  0x53   : > { %p2167_p8 = pnand %p2166_p10, %p2160_p3 }
  0x55   : > { %2170 = shalt.err (!%p2167_p8)
}
  0x56   : > { %1948 = dma.hbm_to_vmem [thread:$0]  (!%p2390_p11), %s2388_s15, 128, %s229_s17, %s218_s27  }
  0x57   : > { %p2519_p13 = scmp.ne.s32.totalorder %s2514_s26, 0 }
  0x58   : > { %s2411_s28 = sand.u32 (!%p2519_p13), 1, %s2235_s19   ;;  %p2520_p8 = scmp.ne.s32.totalorder (!%p2519_p13), %s2512_s24, 0 }
  0x59   : > { %237 = sbr.rel (%p2519_p13) target bundleno = 585 (0x249), region = 40  ;;  %s1693_s30 = sshll.u32 (!%p2519_p13), %s2411_s28, 3 }
  0x5a   : > { %s240_s7 = scalar_lea.sflag (!%p2519_p13), [#allocation3], %s2411_s28  ;;  %s2417_s9 = scalar_lea.vmem (!%p2519_p13), [#allocation2], %s1693_s30 }
  0x5e   : > { %2214 = dma.done.wait (%p2520_p8), %s240_s7, 128  }
  0x5f   : > { %2216 = vsyncadd (%p2520_p8), %s240_s7, 4294967168  ;;  %p2521_p10 = scmp.eq.s32.totalorder %s2306_s22, 0 }
  0x61   : > { %2218 = dma.done.wait (%p2521_p10), [#allocation6], 8320   ;;  %p2522_p11 = pmov %p2521_p10 }
  0x62   : > { %p2523_p1 = pmov %p2521_p10 }
  0x63   : > { %2220 = vsyncadd (%p2522_p11), [#allocation6], 4294958976 }
  0x64   : > { %2222 = dma.done.wait (%p2523_p1), [#allocation9], 8192   ;;  %p2524_p2 = pmov %p2523_p1 }
  0x65   : > { %v2253_v0 = vmov 0   ;;  %v341_v1 = vld [vmem:[#allocation5 + $0x1c0] sm:$0xff]  ;;  %v342_v3 = vld [vmem:[#allocation5 + $0x1c8] sm:$0xff]  ;;  %v343_v60 = vld [vmem:[#allocation5 + $0x1d0] sm:$0xff]  ;;  %s1828_s15 = sshll.u32 %s2306_s22, 7  ;;  %s281_s17 = scalar_lea.vmem [#allocation10], %s1693_s30 }
  0x66   : > { %2224 = vsyncadd (%p2524_p2), [#allocation9], 4294959104  ;;  %743 = vmatprep.mubr.bf16.mxu0 %v2253_v0  ;;  %784 = vmatprep.mubr.bf16.mxu1 %v2253_v0  ;;  %v345_v2 = vld [vmem:[#allocation5 + $0x1e0] sm:$0xff]  ;;  %v346_v5 = vld [vmem:[#allocation5 + $0x1e8] sm:$0xff]  ;;  %s1585_s23 = sshll.u32 %s281_s17, 4  ;;  %s1583_s8 = scalar_lea.hbm %s2507_s5, %s1828_s15  ;;  %s1586_s23 = int_to_ptr.vmem [resolvable:$true] %s1585_s23 }
  0x67   : > { %v1755_v4 = vcombine.high %v341_v1, %v345_v2  ;;  %v1754_v6 = vcombine.low %v341_v1, %v345_v2  ;;  %v333_v7 = vld [vmem:[#allocation5 + $0x180] sm:$0xff]  ;;  %v1757_v9 = vcombine.high %v342_v3, %v346_v5  ;;  %v1756_v10 = vcombine.low %v342_v3, %v346_v5  ;;  %v334_v12 = vld [vmem:[#allocation5 + $0x188] sm:$0xff]  ;;  %v347_v63 = vld [vmem:[#allocation5 + $0x1f0] sm:$0xff]  ;;  %s1572_s13 = scalar_lea.sflag [#allocation4], %s2411_s28  ;;  %s2171_s29 = scalar_lea.vmem %s1586_s23, 128 }
  0x68   : > { %v337_v8 = vld [vmem:[#allocation5 + $0x1a0] sm:$0xff]  ;;  %v338_v13 = vld [vmem:[#allocation5 + $0x1a8] sm:$0xff]  ;;  %v283_v2 = vld [vmem:[%s2417_s9] sm:$0xff]  ;;  %p2172_p4 = scmp.ne.s32.totalorder %s1586_s23, %s2171_s29  ;;  %p2525_p6 = scmp.ne.s32.totalorder %s2517_s11, 0 }
  0x69   : > { %v1747_v11 = vcombine.high %v333_v7, %v337_v8  ;;  %v325_v14 = vld [vmem:[#allocation5 + $0x140] sm:$0xff]  ;;  %711 = vmatprep.subr.bf16.mxu0 %v1755_v4  ;;  %v1749_v15 = vcombine.high %v334_v12, %v338_v13  ;;  %v326_v17 = vld [vmem:[#allocation5 + $0x148] sm:$0xff]  ;;  %752 = vmatprep.subr.bf16.mxu1 %v1757_v9  ;;  %v1746_v19 = vcombine.low %v333_v7, %v337_v8  ;;  %v344_v3 = vld [vmem:[#allocation5 + $0x1d8] sm:$0xff]  ;;  %s2254_s22 = smov [#allocation10]  }
  0x6a   : > { %v329_v16 = vld [vmem:[#allocation5 + $0x160] sm:$0xff]  ;;  %v330_v18 = vld [vmem:[#allocation5 + $0x168] sm:$0xff]  ;;  %712 = vmatpush1.bf16.msra.mxu0 %v1754_v6  ;;  %753 = vmatpush1.bf16.msra.mxu1 %v1756_v10  ;;  %v1748_v20 = vcombine.low %v334_v12, %v338_v13  ;;  %v348_v4 = vld [vmem:[#allocation5 + $0x1f8] sm:$0xff]  ;;  %v1759_v8 = vcombine.high %v343_v60, %v347_v63  ;;  %v2434_v12 = vpack.c.bf16 %v283_v2, %v283_v2  ;;  %p2173_p12 = pnand %p2172_p4, %p2525_p6  ;;  %s2175_s14 = sshll.u32 %s2254_s22, 4  ;;  %s2176_s14 = int_to_ptr.vmem [resolvable:$false] %s2175_s14 }
  0x6b   : > { %713 = vmatprep.subr.bf16.mxu0 %v1747_v11  ;;  %v1739_v21 = vcombine.high %v325_v14, %v329_v16  ;;  %754 = vmatprep.subr.bf16.mxu1 %v1749_v15  ;;  %v1741_v22 = vcombine.high %v326_v17, %v330_v18  ;;  %v317_v23 = vld [vmem:[#allocation5 + $0x100] sm:$0xff]  ;;  %v318_v25 = vld [vmem:[#allocation5 + $0x108] sm:$0xff]  ;;  %v1738_v27 = vcombine.low %v325_v14, %v329_v16  ;;  %v335_v6 = vld [vmem:[#allocation5 + $0x190] sm:$0xff]  ;;  %s2177_s16 = scalar_lea.vmem %s2176_s14, 256  ;;  %p2178_p5 = scmp.lt.s32.totalorder %s1586_s23, %s2176_s14 }
  0x6c   : > { %v321_v24 = vld [vmem:[#allocation5 + $0x120] sm:$0xff]  ;;  %v322_v26 = vld [vmem:[#allocation5 + $0x128] sm:$0xff]  ;;  %v1740_v28 = vcombine.low %v326_v17, %v330_v18  ;;  %v339_v9 = vld [vmem:[#allocation5 + $0x1b0] sm:$0xff]  ;;  %v1761_v10 = vcombine.high %v344_v3, %v348_v4  ;;  %v1758_v14 = vcombine.low %v343_v60, %v347_v63  ;;  %v1760_v16 = vcombine.low %v344_v3, %v348_v4  ;;  %p2174_p0 = pneg %p2173_p12  ;;  %p2179_p3 = scmp.lt.s32.totalorder %s2177_s16, %s2171_s29 }
  0x6d   : > { %v1731_v29 = vcombine.high %v317_v23, %v321_v24  ;;  %v1733_v30 = vcombine.high %v318_v25, %v322_v26  ;;  %v309_v31 = vld [vmem:[#allocation5 + $0xc0] sm:$0xff]  ;;  %v310_v33 = vld [vmem:[#allocation5 + $0xc8] sm:$0xff]  ;;  %v1730_v35 = vcombine.low %v317_v23, %v321_v24  ;;  %v1732_v36 = vcombine.low %v318_v25, %v322_v26  ;;  %v336_v11 = vld [vmem:[#allocation5 + $0x198] sm:$0xff] }
  0x6e   : > { %714 = vmatpush1.bf16.msra.mxu0 %v1746_v19  ;;  %755 = vmatpush1.bf16.msra.mxu1 %v1748_v20  ;;  %v313_v32 = vld [vmem:[#allocation5 + $0xe0] sm:$0xff]  ;;  %v314_v34 = vld [vmem:[#allocation5 + $0xe8] sm:$0xff]  ;;  %v340_v13 = vld [vmem:[#allocation5 + $0x1b8] sm:$0xff]  ;;  %v1751_v17 = vcombine.high %v335_v6, %v339_v9  ;;  %p2180_p7 = por %p2179_p3, %p2178_p5 }
  0x6f   : > { %715 = vmatprep.subr.bf16.mxu0 %v1739_v21  ;;  %756 = vmatprep.subr.bf16.mxu1 %v1741_v22  ;;  %v1723_v37 = vcombine.high %v309_v31, %v313_v32  ;;  %v1725_v38 = vcombine.high %v310_v33, %v314_v34  ;;  %v301_v39 = vld [vmem:[#allocation5 + $0x80] sm:$0xff]  ;;  %v302_v41 = vld [vmem:[#allocation5 + $0x88] sm:$0xff]  ;;  %v1722_v43 = vcombine.low %v309_v31, %v313_v32  ;;  %v327_v15 = vld [vmem:[#allocation5 + $0x150] sm:$0xff] }
  0x70   : > { %v305_v40 = vld [vmem:[#allocation5 + $0xa0] sm:$0xff]  ;;  %v306_v42 = vld [vmem:[#allocation5 + $0xa8] sm:$0xff]  ;;  %v1724_v44 = vcombine.low %v310_v33, %v314_v34  ;;  %v331_v18 = vld [vmem:[#allocation5 + $0x170] sm:$0xff]  ;;  %v1753_v19 = vcombine.high %v336_v11, %v340_v13  ;;  %v1750_v22 = vcombine.low %v335_v6, %v339_v9  ;;  %v1752_v24 = vcombine.low %v336_v11, %v340_v13  ;;  %p2181_p9 = pnand %p2180_p7, %p2174_p0 }
  0x71   : > { %v1715_v45 = vcombine.high %v301_v39, %v305_v40  ;;  %v1717_v46 = vcombine.high %v302_v41, %v306_v42  ;;  %v293_v47 = vld [vmem:[#allocation5 + $0x40] sm:$0xff]  ;;  %v294_v49 = vld [vmem:[#allocation5 + $0x48] sm:$0xff]  ;;  %v1714_v51 = vcombine.low %v301_v39, %v305_v40  ;;  %v1716_v52 = vcombine.low %v302_v41, %v306_v42  ;;  %v328_v20 = vld [vmem:[#allocation5 + $0x158] sm:$0xff] }
  0x72   : > { %716 = vmatpush1.bf16.msra.mxu0 %v1738_v27  ;;  %757 = vmatpush1.bf16.msra.mxu1 %v1740_v28  ;;  %v297_v48 = vld [vmem:[#allocation5 + $0x60] sm:$0xff]  ;;  %v298_v50 = vld [vmem:[#allocation5 + $0x68] sm:$0xff]  ;;  %v332_v21 = vld [vmem:[#allocation5 + $0x178] sm:$0xff]  ;;  %v1743_v25 = vcombine.high %v327_v15, %v331_v18 }
  0x73   : > { %717 = vmatprep.subr.bf16.mxu0 %v1731_v29  ;;  %758 = vmatprep.subr.bf16.mxu1 %v1733_v30  ;;  %v1707_v53 = vcombine.high %v293_v47, %v297_v48  ;;  %v285_v54 = vld [vmem:[#allocation5] sm:$0xff]  ;;  %v1709_v56 = vcombine.high %v294_v49, %v298_v50  ;;  %v286_v57 = vld [vmem:[#allocation5 + $0x8] sm:$0xff]  ;;  %v1706_v59 = vcombine.low %v293_v47, %v297_v48  ;;  %v319_v23 = vld [vmem:[#allocation5 + $0x110] sm:$0xff] }
  0x74   : > { %v289_v55 = vld [vmem:[#allocation5 + $0x20] sm:$0xff]  ;;  %v290_v58 = vld [vmem:[#allocation5 + $0x28] sm:$0xff]  ;;  %v1708_v61 = vcombine.low %v294_v49, %v298_v50  ;;  %v323_v26 = vld [vmem:[#allocation5 + $0x130] sm:$0xff]  ;;  %v1745_v27 = vcombine.high %v328_v20, %v332_v21  ;;  %v1742_v30 = vcombine.low %v327_v15, %v331_v18  ;;  %v1744_v32 = vcombine.low %v328_v20, %v332_v21 }
  0x75   : > { %v1699_v62 = vcombine.high %v285_v54, %v289_v55  ;;  %v1701_v1 = vcombine.high %v286_v57, %v290_v58  ;;  %v1698_v5 = vcombine.low %v285_v54, %v289_v55  ;;  %v1700_v7 = vcombine.low %v286_v57, %v290_v58  ;;  %v320_v28 = vld [vmem:[#allocation5 + $0x118] sm:$0xff]  ;;  %v311_v31 = vld [vmem:[#allocation5 + $0xd0] sm:$0xff]  ;;  %v2001_v2 = vld [vmem:[#allocation8 + $0x78] sm:$0xff]  }
  0x76   : > { %718 = vmatpush1.bf16.msra.mxu0 %v1730_v35  ;;  %759 = vmatpush1.bf16.msra.mxu1 %v1732_v36  ;;  %v324_v29 = vld [vmem:[#allocation5 + $0x138] sm:$0xff]  ;;  %v1735_v33 = vcombine.high %v319_v23, %v323_v26  ;;  %v315_v34 = vld [vmem:[#allocation5 + $0xf0] sm:$0xff]  ;;  %v2002_v4 = vld [vmem:[#allocation8 + $0xf8] sm:$0xff]  }
  0x77   : > { %719 = vmatprep.subr.bf16.mxu0 %v1723_v37  ;;  %760 = vmatprep.subr.bf16.mxu1 %v1725_v38  ;;  %v1737_v35 = vcombine.high %v320_v28, %v324_v29  ;;  %v312_v36 = vld [vmem:[#allocation5 + $0xd8] sm:$0xff]  ;;  %v1734_v38 = vcombine.low %v319_v23, %v323_v26  ;;  %v303_v39 = vld [vmem:[#allocation5 + $0x90] sm:$0xff]  ;;  %v1736_v41 = vcombine.low %v320_v28, %v324_v29  ;;  %v2003_v6 = vld [vmem:[#allocation8 + $0x38] sm:$0xff]  }
  0x78   : > { %v316_v37 = vld [vmem:[#allocation5 + $0xf8] sm:$0xff]  ;;  %v307_v40 = vld [vmem:[#allocation5 + $0xb0] sm:$0xff]  ;;  %v2014_v18 = vld [vmem:[#allocation8 + $0xe0] sm:$0xff]  }
  0x79   : > { %v304_v42 = vld [vmem:[#allocation5 + $0x98] sm:$0xff]  ;;  %v299_v47 = vld [vmem:[#allocation5 + $0x70] sm:$0xff]  ;;  %v1728_v48 = vcombine.low %v312_v36, %v316_v37  ;;  %v1719_v49 = vcombine.high %v303_v39, %v307_v40  ;;  %v2016_v20 = vld [vmem:[#allocation8 + $0xa0] sm:$0xff]  }
  0x7a   : > { %720 = vmatpush1.bf16.msra.mxu0 %v1722_v43  ;;  %761 = vmatpush1.bf16.msra.mxu1 %v1724_v44  ;;  %v308_v43 = vld [vmem:[#allocation5 + $0xb8] sm:$0xff]  ;;  %v1729_v44 = vcombine.high %v312_v36, %v316_v37  ;;  %v287_v54 = vld [vmem:[#allocation5 + $0x10] sm:$0xff]  ;;  %v2017_v21 = vld [vmem:[#allocation8 + $0x58] sm:$0xff]  }
  0x7b   : > { %721 = vmatprep.subr.bf16.mxu0 %v1715_v45  ;;  %762 = vmatprep.subr.bf16.mxu1 %v1717_v46  ;;  %v1726_v45 = vcombine.low %v311_v31, %v315_v34  ;;  %v295_v46 = vld [vmem:[#allocation5 + $0x50] sm:$0xff]  ;;  %v296_v50 = vld [vmem:[#allocation5 + $0x58] sm:$0xff]  ;;  %v2020_v23 = vld [vmem:[#allocation8 + $0x98] sm:$0xff]  }
  0x7c   : > { %v291_v55 = vld [vmem:[#allocation5 + $0x30] sm:$0xff]  ;;  %v1711_v57 = vcombine.high %v295_v46, %v299_v47  ;;  %v288_v58 = vld [vmem:[#allocation5 + $0x18] sm:$0xff]  ;;  %v2033_v36 = vld [vmem:[#allocation8 + $0x178] sm:$0xff]  }
  0x7d   : > { %v1703_v63 = vcombine.high %v287_v54, %v291_v55  ;;  %v1702_v3 = vcombine.low %v287_v54, %v291_v55  ;;  %v2006_v9 = vld [vmem:[#allocation8 + $0xf0] sm:$0xff]   ;;  %v2009_v13 = vld [vmem:[#allocation8 + $0x68] sm:$0xff]   ;;  %v2034_v37 = vld [vmem:[#allocation8 + $0x1f8] sm:$0xff]  }
  0x7e   : > { %722 = vmatpush1.bf16.msra.mxu0 %v1714_v51  ;;  %763 = vmatpush1.bf16.msra.mxu1 %v1716_v52  ;;  %v300_v51 = vld [vmem:[#allocation5 + $0x78] sm:$0xff]  ;;  %v1721_v52 = vcombine.high %v304_v42, %v308_v43  ;;  %v2011_v15 = vld [vmem:[#allocation8 + $0x28] sm:$0xff]  }
  0x7f   : > { %723 = vmatprep.subr.bf16.mxu0 %v1707_v53  ;;  %764 = vmatprep.subr.bf16.mxu1 %v1709_v56  ;;  %v1718_v53 = vcombine.low %v303_v39, %v307_v40  ;;  %v1720_v56 = vcombine.low %v304_v42, %v308_v43  ;;  %v1713_v60 = vcombine.high %v296_v50, %v300_v51  ;;  %v2008_v11 = vld [vmem:[#allocation8 + $0xb0] sm:$0xff]   ;;  %v2025_v28 = vld [vmem:[#allocation8 + $0x48] sm:$0xff]  }
  0x80   : > { %v2023_v26 = vld [vmem:[#allocation8 + $0x10] sm:$0xff]   ;;  %v2026_v29 = vld [vmem:[#allocation8 + $0xc8] sm:$0xff]  }
  0x82   : > { %724 = vmatpush1.bf16.msra.mxu0 %v1706_v59  ;;  %765 = vmatpush1.bf16.msra.mxu1 %v1708_v61  ;;  %v292_v59 = vld [vmem:[#allocation5 + $0x38] sm:$0xff]  ;;  %v1710_v61 = vcombine.low %v295_v46, %v299_v47 }
  0x83   : > { %725 = vmatprep.subr.bf16.mxu0 %v1699_v62  ;;  %766 = vmatprep.subr.bf16.mxu1 %v1701_v1  ;;  %v1712_v62 = vcombine.low %v296_v50, %v300_v51  ;;  %v1705_v1 = vcombine.high %v288_v58, %v292_v59 }
  0x86   : > { %726 = vmatpush1.bf16.msra.mxu0 %v1698_v5  ;;  %767 = vmatpush1.bf16.msra.mxu1 %v1700_v7  ;;  %v1704_v5 = vcombine.low %v288_v58, %v292_v59  ;;  %v2004_v7 = vld [vmem:[#allocation8 + $0xb8] sm:$0xff]  }
  0x87   : > { %793 = vmatprep.subr.bf16.mxu0 %v1759_v8  ;;  %834 = vmatprep.subr.bf16.mxu1 %v1761_v10  ;;  %v2005_v8 = vld [vmem:[#allocation8 + $0x70] sm:$0xff]  }
  0x88   : > { %v2007_v10 = vld [vmem:[#allocation8 + $0x30] sm:$0xff]  }
  0x89   : > { %744 = vmatmul.mubr.bf16.vlgmr.msra.gmra.mxu0 %v2434_v12  ;;  %785 = vmatmul.mubr.bf16.vlgmr.msra.gmra.mxu1 %v2434_v12 }
  0x8a   : > { %794 = vmatpush1.bf16.msra.mxu0 %v1758_v14  ;;  %835 = vmatpush1.bf16.msra.mxu1 %v1760_v16  ;;  %v2010_v14 = vld [vmem:[#allocation8 + $0xe8] sm:$0xff]  }
  0x8b   : > { %795 = vmatprep.subr.bf16.mxu0 %v1751_v17  ;;  %836 = vmatprep.subr.bf16.mxu1 %v1753_v19  ;;  %v2012_v16 = vld [vmem:[#allocation8 + $0xa8] sm:$0xff]   ;;  %v2013_v17 = vld [vmem:[#allocation8 + $0x60] sm:$0xff]  }
  0x8c   : > { %825 = vmatprep.mubr.bf16.mxu0 %v2253_v0  ;;  %866 = vmatprep.mubr.bf16.mxu1 %v2253_v0  ;;  %v1727_v0 = vcombine.high %v311_v31, %v315_v34  ;;  %v2015_v19 = vld [vmem:[#allocation8 + $0x20] sm:$0xff]   ;;  %v2028_v31 = vld [vmem:[#allocation8 + $0x88] sm:$0xff]  }
  0x8d   : > { %v2031_v34 = vld [vmem:[#allocation8] sm:$0xff]  }
  0x8e   : > { %796 = vmatpush1.bf16.msra.mxu0 %v1750_v22  ;;  %837 = vmatpush1.bf16.msra.mxu1 %v1752_v24  ;;  %v2019_v22 = vld [vmem:[#allocation8 + $0x18] sm:$0xff]   ;;  %v2021_v24 = vld [vmem:[#allocation8 + $0x50] sm:$0xff]  }
  0x8f   : > { %797 = vmatprep.subr.bf16.mxu0 %v1743_v25  ;;  %838 = vmatprep.subr.bf16.mxu1 %v1745_v27  ;;  %v2022_v25 = vld [vmem:[#allocation8 + $0xd0] sm:$0xff]  }
  0x90   : > { %v2024_v27 = vld [vmem:[#allocation8 + $0x90] sm:$0xff]  }
  0x92   : > { %798 = vmatpush1.bf16.msra.mxu0 %v1742_v30  ;;  %839 = vmatpush1.bf16.msra.mxu1 %v1744_v32  ;;  %v2027_v30 = vld [vmem:[#allocation8 + $0x8] sm:$0xff]   ;;  %v2029_v32 = vld [vmem:[#allocation8 + $0x40] sm:$0xff]  }
  0x93   : > { %799 = vmatprep.subr.bf16.mxu0 %v1735_v33  ;;  %840 = vmatprep.subr.bf16.mxu1 %v1737_v35  ;;  %v2030_v33 = vld [vmem:[#allocation8 + $0xc0] sm:$0xff]  }
  0x94   : > { %v2032_v35 = vld [vmem:[#allocation8 + $0x80] sm:$0xff]  }
  0x96   : > { %800 = vmatpush1.bf16.msra.mxu0 %v1734_v38  ;;  %841 = vmatpush1.bf16.msra.mxu1 %v1736_v41  ;;  %v351_v38 = vlaneseq  ;;  %v2445_v41 = vld [vmem:[#allocation7] sm:$0xff] }
  0x97   : > { %801 = vmatprep.subr.bf16.mxu0 %v1727_v0  ;;  %842 = vmatprep.subr.bf16.mxu1 %v1729_v44 }
  0x98   : > { %v2442_v39 = vshrl.u32 %v351_v38, 7 }
  0x9a   : > { %802 = vmatpush1.bf16.msra.mxu0 %v1726_v45  ;;  %843 = vmatpush1.bf16.msra.mxu1 %v1728_v48  ;;  %v353_v40 = vsub.s32 0, %v2442_v39  ;;  %v361_v0 = vsub.s32 2, %v2442_v39  ;;  %v357_v42 = vsub.s32 1, %v2442_v39  ;;  %v365_v43 = vsub.s32 3, %v2442_v39 }
  0x9b   : > { %803 = vmatprep.subr.bf16.mxu0 %v1719_v49  ;;  %844 = vmatprep.subr.bf16.mxu1 %v1721_v52 }
  0x9c   : > { %v354_v44 = vrot.slane %v2445_v41, %v353_v40  ;;  %v362_v45 = vrot.slane %v2445_v41, %v361_v0  ;;  %v358_v46 = vrot.slane %v2445_v41, %v357_v42  ;;  %v366_v48 = vrot.slane %v2445_v41, %v365_v43  ;;  %v2060_v40 = vld [vmem:[#allocation8 + $0x188] sm:$0xff]   ;;  %v2061_v0 = vld [vmem:[#allocation8 + $0x140] sm:$0xff]  }
  0x9d   : > { %v2062_v43 = vld [vmem:[#allocation8 + $0x1c0] sm:$0xff]  }
  0x9e   : > { %804 = vmatpush1.bf16.msra.mxu0 %v1718_v53  ;;  %845 = vmatpush1.bf16.msra.mxu1 %v1720_v56 }
  0x9f   : > { %805 = vmatprep.subr.bf16.mxu0 %v1711_v57  ;;  %846 = vmatprep.subr.bf16.mxu1 %v1713_v60 }
  0xa2   : > { %806 = vmatpush1.bf16.msra.mxu0 %v1710_v61  ;;  %847 = vmatpush1.bf16.msra.mxu1 %v1712_v62 }
  0xa3   : > { %807 = vmatprep.subr.bf16.mxu0 %v1703_v63  ;;  %848 = vmatprep.subr.bf16.mxu1 %v1705_v1 }
  0xa6   : > { %808 = vmatpush1.bf16.msra.mxu0 %v1702_v3  ;;  %849 = vmatpush1.bf16.msra.mxu1 %v1704_v5  ;;  %v2035_v3 = vld [vmem:[#allocation8 + $0x138] sm:$0xff]  }
  0xa7   : > { %1831 = vmatprep.subr.bf16.mxu0 %v2001_v2  ;;  %1853 = vmatprep.subr.bf16.mxu1 %v2002_v4 }
  0xa9   : > { %826 = vmatmul.mubr.bf16.vlgmr.msra.gmra.mxu0 %v2434_v12  ;;  %867 = vmatmul.mubr.bf16.vlgmr.msra.gmra.mxu1 %v2434_v12  ;;  %v2018_v12 = vld [vmem:[#allocation8 + $0xd8] sm:$0xff]  }
  0xaa   : > { %1832 = vmatpush3.bf16.msra.mxu0 %v2003_v6  ;;  %1854 = vmatpush3.bf16.msra.mxu1 %v2004_v7  ;;  %v2036_v6 = vld [vmem:[#allocation8 + $0x1b8] sm:$0xff]   ;;  %v2037_v7 = vld [vmem:[#allocation8 + $0x170] sm:$0xff]  }
  0xab   : > { %1833 = vmatprep.subr.bf16.mxu0 %v2005_v8  ;;  %1855 = vmatprep.subr.bf16.mxu1 %v2006_v9  ;;  %v2038_v8 = vld [vmem:[#allocation8 + $0x1f0] sm:$0xff]  }
  0xac   : > { %v2039_v9 = vld [vmem:[#allocation8 + $0x130] sm:$0xff]  }
  0xae   : > { %1834 = vmatpush3.bf16.msra.mxu0 %v2007_v10  ;;  %1856 = vmatpush3.bf16.msra.mxu1 %v2008_v11  ;;  %v2040_v10 = vld [vmem:[#allocation8 + $0x1b0] sm:$0xff]   ;;  %v2041_v11 = vld [vmem:[#allocation8 + $0x168] sm:$0xff]  }
  0xaf   : > { %1835 = vmatprep.subr.bf16.mxu0 %v2009_v13  ;;  %1857 = vmatprep.subr.bf16.mxu1 %v2010_v14  ;;  %v2042_v13 = vld [vmem:[#allocation8 + $0x1e8] sm:$0xff]  }
  0xb0   : > { %v2043_v14 = vld [vmem:[#allocation8 + $0x128] sm:$0xff]  }
  0xb2   : > { %1836 = vmatpush3.bf16.msra.mxu0 %v2011_v15  ;;  %1858 = vmatpush3.bf16.msra.mxu1 %v2012_v16  ;;  %v2044_v15 = vld [vmem:[#allocation8 + $0x1a8] sm:$0xff]   ;;  %v2045_v16 = vld [vmem:[#allocation8 + $0x160] sm:$0xff]  }
  0xb3   : > { %1837 = vmatprep.subr.bf16.mxu0 %v2013_v17  ;;  %1859 = vmatprep.subr.bf16.mxu1 %v2014_v18  ;;  %v2046_v17 = vld [vmem:[#allocation8 + $0x1e0] sm:$0xff]  }
  0xb4   : > { %v2047_v18 = vld [vmem:[#allocation8 + $0x120] sm:$0xff]  }
  0xb6   : > { %1838 = vmatpush3.bf16.msra.mxu0 %v2015_v19  ;;  %1860 = vmatpush3.bf16.msra.mxu1 %v2016_v20  ;;  %v2048_v19 = vld [vmem:[#allocation8 + $0x1a0] sm:$0xff]   ;;  %v2049_v20 = vld [vmem:[#allocation8 + $0x158] sm:$0xff]  }
  0xb7   : > { %1839 = vmatprep.subr.bf16.mxu0 %v2017_v21  ;;  %1861 = vmatprep.subr.bf16.mxu1 %v2018_v12  ;;  %v2050_v21 = vld [vmem:[#allocation8 + $0x1d8] sm:$0xff]  }
  0xb8   : > { %v2051_v12 = vld [vmem:[#allocation8 + $0x118] sm:$0xff]  }
  0xba   : > { %1840 = vmatpush3.bf16.msra.mxu0 %v2019_v22  ;;  %1862 = vmatpush3.bf16.msra.mxu1 %v2020_v23  ;;  %v2052_v22 = vld [vmem:[#allocation8 + $0x198] sm:$0xff]   ;;  %v2053_v23 = vld [vmem:[#allocation8 + $0x150] sm:$0xff]  }
  0xbb   : > { %1841 = vmatprep.subr.bf16.mxu0 %v2021_v24  ;;  %1863 = vmatprep.subr.bf16.mxu1 %v2022_v25  ;;  %v2054_v24 = vld [vmem:[#allocation8 + $0x1d0] sm:$0xff]   ;;  %v369_v25 = vsub.s32 4, %v2442_v39 }
  0xbe   : > { %1842 = vmatpush3.bf16.msra.mxu0 %v2023_v26  ;;  %1864 = vmatpush3.bf16.msra.mxu1 %v2024_v27  ;;  %v377_v26 = vsub.s32 6, %v2442_v39  ;;  %v2055_v27 = vld [vmem:[#allocation8 + $0x110] sm:$0xff]  }
  0xbf   : > { %1843 = vmatprep.subr.bf16.mxu0 %v2025_v28  ;;  %1865 = vmatprep.subr.bf16.mxu1 %v2026_v29  ;;  %v373_v28 = vsub.s32 5, %v2442_v39  ;;  %v2056_v29 = vld [vmem:[#allocation8 + $0x190] sm:$0xff]  }
  0xc2   : > { %1844 = vmatpush3.bf16.msra.mxu0 %v2027_v30  ;;  %1866 = vmatpush3.bf16.msra.mxu1 %v2028_v31  ;;  %v381_v30 = vsub.s32 7, %v2442_v39  ;;  %v2057_v31 = vld [vmem:[#allocation8 + $0x148] sm:$0xff]  }
  0xc3   : > { %1845 = vmatprep.subr.bf16.mxu0 %v2029_v32  ;;  %1867 = vmatprep.subr.bf16.mxu1 %v2030_v33  ;;  %v370_v32 = vrot.slane %v2445_v41, %v369_v25  ;;  %v2058_v33 = vld [vmem:[#allocation8 + $0x1c8] sm:$0xff]  }
  0xc4   : > { %v382_v38 = vrot.slane %v2445_v41, %v381_v30 }
  0xc6   : > { %1846 = vmatpush3.bf16.msra.mxu0 %v2031_v34  ;;  %1868 = vmatpush3.bf16.msra.mxu1 %v2032_v35  ;;  %v378_v34 = vrot.slane %v2445_v41, %v377_v26  ;;  %v374_v35 = vrot.slane %v2445_v41, %v373_v28  ;;  %v2064_v41 = vld [vmem:[#allocation8 + $0x180] sm:$0xff]  }
  0xc7   : > { %1875 = vmatprep.subr.bf16.mxu0 %v2033_v36  ;;  %1897 = vmatprep.subr.bf16.mxu1 %v2034_v37  ;;  %v2059_v36 = vld [vmem:[#allocation8 + $0x108] sm:$0xff]  }
 0x149   : > { %v745_v47 = vpop.f32.mrf.mxu0  ;;  %v786_v50 = vpop.f32.mrf.mxu1 }
 0x14a   : > { %v746_v49 = vadd.f32 %v745_v47, %v354_v44  ;;  %v787_v51 = vadd.f32 %v786_v50, %v362_v45 }
 0x14b   : > { %v747_v52 = vpop.f32.mrf.mxu0  ;;  %v788_v54 = vpop.f32.mrf.mxu1 }
 0x14c   : > { %v748_v53 = vadd.f32 %v747_v52, %v358_v46  ;;  %v875_v55 = vmax.f32 %v746_v49, 0.0  ;;  %v877_v56 = vmax.f32 %v787_v51, 0.0  ;;  %v789_v57 = vadd.f32 %v788_v54, %v366_v48  ;;  %v2063_v48 = vld [vmem:[#allocation8 + $0x100] sm:$0xff]  }
 0x14d   : > { %v749_v58 = vpop.f32.mrf.mxu0  ;;  %v790_v60 = vpop.f32.mrf.mxu1 }
 0x14e   : > { %v876_v59 = vmax.f32 %v748_v53, 0.0  ;;  %v878_v61 = vmax.f32 %v789_v57, 0.0  ;;  %v885_v63 = vpack.c.bf16 %v877_v56, %v877_v56  ;;  %v883_v4 = vpack.c.bf16 %v875_v55, %v875_v55 }
 0x14f   : > { %v750_v62 = vpop.f32.mrf.mxu0  ;;  %v791_v2 = vpop.f32.mrf.mxu1 }
 0x150   : > { %v884_v1 = vpack.c.bf16 %v876_v59, %v876_v59  ;;  %v886_v5 = vpack.c.bf16 %v878_v61, %v878_v61 }
 0x152   : > { %1442 = vmatprep.mubr.bf16.mxu0 %v884_v1  ;;  %1482 = vmatprep.mubr.bf16.mxu1 %v886_v5 }
 0x153   : > { %1443 = vmatmul.mubr.bf16.vlgmr.msra.gmra.mxu0 %v883_v4  ;;  %1483 = vmatmul.mubr.bf16.vlgmr.msra.gmra.mxu1 %v885_v63 }
 0x154   : > { %1876 = vmatpush3.bf16.msra.mxu0 %v2035_v3  ;;  %1898 = vmatpush3.bf16.msra.mxu1 %v2036_v6 }
 0x155   : > { %1877 = vmatprep.subr.bf16.mxu0 %v2037_v7  ;;  %1899 = vmatprep.subr.bf16.mxu1 %v2038_v8  ;;  %v1762_v8 = vld [vmem:[%s2506_s4] ss:$0 sm:$0xff] }
 0x158   : > { %1878 = vmatpush3.bf16.msra.mxu0 %v2039_v9  ;;  %1900 = vmatpush3.bf16.msra.mxu1 %v2040_v10 }
 0x159   : > { %1879 = vmatprep.subr.bf16.mxu0 %v2041_v11  ;;  %1901 = vmatprep.subr.bf16.mxu1 %v2042_v13 }
 0x15c   : > { %1880 = vmatpush3.bf16.msra.mxu0 %v2043_v14  ;;  %1902 = vmatpush3.bf16.msra.mxu1 %v2044_v15 }
 0x15d   : > { %1881 = vmatprep.subr.bf16.mxu0 %v2045_v16  ;;  %1903 = vmatprep.subr.bf16.mxu1 %v2046_v17 }
 0x160   : > { %1882 = vmatpush3.bf16.msra.mxu0 %v2047_v18  ;;  %1904 = vmatpush3.bf16.msra.mxu1 %v2048_v19 }
 0x161   : > { %1883 = vmatprep.subr.bf16.mxu0 %v2049_v20  ;;  %1905 = vmatprep.subr.bf16.mxu1 %v2050_v21 }
 0x164   : > { %1884 = vmatpush3.bf16.msra.mxu0 %v2051_v12  ;;  %1906 = vmatpush3.bf16.msra.mxu1 %v2052_v22 }
 0x165   : > { %1885 = vmatprep.subr.bf16.mxu0 %v2053_v23  ;;  %1907 = vmatprep.subr.bf16.mxu1 %v2054_v24 }
 0x168   : > { %1886 = vmatpush3.bf16.msra.mxu0 %v2055_v27  ;;  %1908 = vmatpush3.bf16.msra.mxu1 %v2056_v29 }
 0x169   : > { %v827_v37 = vpop.f32.mrf.mxu0  ;;  %1887 = vmatprep.subr.bf16.mxu0 %v2057_v31  ;;  %v868_v39 = vpop.f32.mrf.mxu1  ;;  %1909 = vmatprep.subr.bf16.mxu1 %v2058_v33 }
 0x16a   : > { %v828_v42 = vadd.f32 %v827_v37, %v370_v32  ;;  %v869_v44 = vadd.f32 %v868_v39, %v378_v34 }
 0x16b   : > { %v829_v45 = vpop.f32.mrf.mxu0  ;;  %v870_v47 = vpop.f32.mrf.mxu1 }
 0x16c   : > { %v830_v46 = vadd.f32 %v829_v45, %v374_v35  ;;  %1888 = vmatpush3.bf16.msra.mxu0 %v2059_v36  ;;  %v879_v49 = vmax.f32 %v828_v42, 0.0  ;;  %v881_v50 = vmax.f32 %v869_v44, 0.0  ;;  %v871_v51 = vadd.f32 %v870_v47, %v382_v38  ;;  %1910 = vmatpush3.bf16.msra.mxu1 %v2060_v40 }
 0x16d   : > { %v831_v52 = vpop.f32.mrf.mxu0  ;;  %1889 = vmatprep.subr.bf16.mxu0 %v2061_v0  ;;  %v872_v54 = vpop.f32.mrf.mxu1  ;;  %1911 = vmatprep.subr.bf16.mxu1 %v2062_v43 }
 0x16e   : > { %v880_v53 = vmax.f32 %v830_v46, 0.0  ;;  %v882_v55 = vmax.f32 %v871_v51, 0.0  ;;  %v889_v57 = vpack.c.bf16 %v881_v50, %v881_v50  ;;  %v887_v60 = vpack.c.bf16 %v879_v49, %v879_v49 }
 0x16f   : > { %v832_v56 = vpop.f32.mrf.mxu0  ;;  %v873_v59 = vpop.f32.mrf.mxu1 }
 0x170   : > { %v888_v58 = vpack.c.bf16 %v880_v53, %v880_v53  ;;  %1890 = vmatpush3.bf16.msra.mxu0 %v2063_v48  ;;  %v890_v61 = vpack.c.bf16 %v882_v55, %v882_v55  ;;  %1912 = vmatpush3.bf16.msra.mxu1 %v2064_v41 }
 0x172   : > { %1522 = vmatprep.mubr.bf16.mxu0 %v888_v58  ;;  %1562 = vmatprep.mubr.bf16.mxu1 %v890_v61 }
 0x173   : > { %1523 = vmatmul.mubr.bf16.vlgmr.msra.gmra.mxu0 %v887_v60  ;;  %1563 = vmatmul.mubr.bf16.vlgmr.msra.gmra.mxu1 %v889_v57 }
 0x213   : > { %v1847_v62 = vpop.f32.mrf.mxu0  ;;  %v1869_v63 = vpop.f32.mrf.mxu1 }
 0x215   : > { %v1848_v1 = vpop.f32.mrf.mxu0  ;;  %v1870_v2 = vpop.f32.mrf.mxu1 }
 0x216   : > { %v1849_v7 = vadd.f32 %v1848_v1, %v1847_v62  ;;  %v1871_v11 = vadd.f32 %v1870_v2, %v1869_v63 }
 0x217   : > { %v1850_v3 = vpop.f32.mrf.mxu0  ;;  %v1872_v4 = vpop.f32.mrf.mxu1 }
 0x218   : > { %v1445_v9 = vadd.f32 %v1849_v7, %v1762_v8 }
 0x219   : > { %v1851_v5 = vpop.f32.mrf.mxu0  ;;  %v1873_v6 = vpop.f32.mrf.mxu1 }
 0x21a   : > { %v1485_v15 = vadd.f32 %v1871_v11, %v1445_v9 }
 0x233   : > { %v1891_v10 = vpop.f32.mrf.mxu0  ;;  %v1913_v13 = vpop.f32.mrf.mxu1 }
 0x235   : > { %v1892_v14 = vpop.f32.mrf.mxu0  ;;  %v1914_v17 = vpop.f32.mrf.mxu1 }
 0x236   : > { %v1893_v16 = vadd.f32 %v1892_v14, %v1891_v10  ;;  %v1915_v20 = vadd.f32 %v1914_v17, %v1913_v13 }
 0x237   : > { %v1894_v18 = vpop.f32.mrf.mxu0  ;;  %v1916_v21 = vpop.f32.mrf.mxu1 }
 0x238   : > { %v1525_v19 = vadd.f32 %v1893_v16, %v1485_v15 }
 0x239   : > { %v1895_v12 = vpop.f32.mrf.mxu0  ;;  %v1917_v23 = vpop.f32.mrf.mxu1 }
 0x23a   : > { %v1565_v22 = vadd.f32 %v1915_v20, %v1525_v19 }
 0x23c   : > { %1570 = vst [vmem:[%s281_s17] sm:$0xff] %v1565_v22 }
 0x23d   : > { %2184 = shalt.err (!%p2181_p9)
}
 0x23e   : > { %s2185_s30 = scalar_lea.hbm %s1583_s8, 128  ;;  %s2189_s9 = scalar_lea.hbm %s2507_s5, 256 }
 0x23f   : > { %p2186_p13 = scmp.ne.s32.totalorder %s1583_s8, %s2185_s30  ;;  %p2190_p11 = scmp.lt.s32.totalorder %s1583_s8, %s2507_s5 }
 0x240   : > { %p2191_p1 = scmp.lt.s32.totalorder %s2189_s9, %s2185_s30 }
 0x241   : > { %p2187_p8 = pnand %p2186_p13, %p2525_p6 }
 0x242   : > { %p2192_p2 = por %p2191_p1, %p2190_p11 }
 0x243   : > { %p2188_p10 = pneg %p2187_p8 }
 0x245   : > { %p2193_p4 = pnand %p2192_p2, %p2188_p10 }
 0x247   : > { %2196 = shalt.err (!%p2193_p4)
}
 0x248   : > { %1933 = dma.vmem_to_hbm [thread:$0]  (%p2525_p6), %s1586_s23, 128, %s1583_s8, %s1572_s13  }
 0x249 PF: > { %s1597_s15 = sand.u32 1, %s2231_s18   ;;  %p2526_p12 = scmp.ne.s32.totalorder %s2513_s25, 0 }
 0x24a   : > { %p2527_p0 = scmp.ge.s32.totalorder %s2243_s21, 2  ;;  %s1598_s17 = scalar_lea.sflag [#allocation4], %s1597_s15 }
 0x24c   : > { %p1950_p5 = pnand %p2527_p0, %p2526_p12 }
 0x24e   : > { %p1951_p3 = pneg %p1950_p5 }
 0x250   : > { %2226 = dma.done.wait (%p1951_p3), %s1598_s17, 128  }
 0x251   : > { %2228 = vsyncadd (%p1951_p3), %s1598_s17, 4294967168  ;;  %p20_p7 = scmp.ge.s32.totalorder %s2365_s6, 4   ;;  %s2528_s18 = smov %s2235_s19 }
 0x252   : > { %s2529_s19 = smov %s2239_s20  ;;  %s2530_s20 = smov %s2375_s10 }
 0x253   : > { %s2531_s21 = smov %s2365_s6  ;;  %22 = sbr.rel (!%p20_p7) target bundleno = 7 (0x7), region = 97 }
 0x258   :  { %1603 = vsyncpa [#allocation3], 1 }
 0x259   :  { %1605 = vsyncpa [#allocation3 + $0x1], 1 }
 0x25a   :  { %1606 = vsyncpa [#allocation6], 1 }
 0x25b   :  { %1607 = vsyncpa [#allocation9], 1 }
 0x25c   :  { %1608 = vsyncpa [#allocation4], 1 }
 0x25d   :  { %1610 = vsyncpa [#allocation4 + $0x1], 1 }

</bundles_post_ra>
